<compile_context>
chip_gen: v7x
topology: tpu7x:2x2x1
jax: 0.10.0
libtpu: 0.0.40
codegen_flags: <defaults>
</compile_context>

<pallas_src>
import functools

import jax
import jax.numpy as jnp
from jax.experimental import pallas as pl
from jax.experimental.pallas import tpu as pltpu

_X_TILE_BYTES = 2 * 1024 * 1024   # target bytes for one (TB, TN*B) input tile
_MAX_TB = 2048
_LANES = 128


def _dequant_kernel(x_ref, w_ref, o_ref, *, int8_mxu, scale, offset):
    # x_ref: (TB, TN*B)   bit values in their input dtype, lane-dense
    # w_ref: (TN*B, TN)   block-diagonal bit-weight matrix (bf16 or int8)
    # o_ref: (TB, TN)     float32 dequantized output
    if int8_mxu:
        num = jnp.dot(x_ref[...].astype(jnp.int8), w_ref[...],
                      preferred_element_type=jnp.int32)
        o_ref[...] = num.astype(jnp.float32) * scale + offset
    else:
        # bf16 feeds the MXU at full rate; products are 0 or a power of two,
        # accumulation is f32, so the result is exact. Scale is folded into W.
        num = jnp.dot(x_ref[...].astype(jnp.bfloat16), w_ref[...],
                      preferred_element_type=jnp.float32)
        o_ref[...] = num + offset


def _bit_weight_matrix(tn, B, dtype, scale):
    # W[n*B + i, m] = scale * 2**(B-1-i) if n == m else 0   (MSB-first)
    weights = scale * (2.0 ** jnp.arange(B - 1, -1, -1, dtype=jnp.float32))
    eye = jnp.eye(tn, dtype=jnp.float32)
    full = (eye[:, None, :] * weights[None, :, None]).reshape(tn * B, tn)
    return full.astype(dtype)


def _device_has_int_mxu():
    """v5e/v5p/v6e have an integer MXU; v7x (and unknown chips) fall back."""
    try:
        kind = jax.devices()[0].device_kind.lower()
    except Exception:  # pragma: no cover - defensive
        return False
    return ("v5" in kind) or ("v6" in kind)


def _pick_batch_tile(batch, tn, B, itemsize):
    """TB so that the x tile (TB, TN*B) stays near the ~2 MiB sweet spot."""
    row_bytes = tn * B * itemsize
    cap = max(8, min(_MAX_TB, (_X_TILE_BYTES // row_bytes) // 8 * 8))
    if batch <= cap:
        return batch          # block == full array dim is always legal
    return cap                # multiple of 8; ragged last block is masked


def dequantization_layer(x, B, *, use_int8_mxu=None):
    """Pallas equivalent of DequantizationLayer(B).forward(x).

    x: [batch, N*B] bit-planes (values 0/1).  Prefer int8/bool bit-planes:
    HBM traffic is then 1 byte per bit instead of 4 for float32 inputs.
    """
    batch, nbits = x.shape
    assert nbits % B == 0, "number of bit columns must be divisible by B"
    assert 1 <= B <= 23, "exactness of the f32 epilogue requires B <= 23"
    N = nbits // B

    # int8 MXU path: only when input is already integer bit-planes, weights fit
    # in int8 (2**(B-1) <= 127 -> B <= 7), and the chip has an integer MXU.
    int8_ok = (B <= 7
               and (jnp.issubdtype(x.dtype, jnp.integer) or x.dtype == jnp.bool_)
               and _device_has_int_mxu())
    int8_mxu = int8_ok if use_int8_mxu is None else (bool(use_int8_mxu) and int8_ok)

    # Pad N up to a multiple of 128 so output stores are lane-dense; crop after.
    n_pad = pl.cdiv(N, _LANES) * _LANES
    if n_pad != N:
        x = jnp.pad(x, ((0, 0), (0, (n_pad - N) * B)))

    TN = _LANES
    TB = _pick_batch_tile(batch, TN, B, x.dtype.itemsize)

    inv_step = float(1.0 / (2 ** B))       # exact power of two
    half = 0.5 * inv_step                  # 2**-(B+1), exact

    if int8_mxu:
        w = _bit_weight_matrix(TN, B, jnp.int8, scale=1.0)
        kernel = functools.partial(_dequant_kernel, int8_mxu=True,
                                   scale=inv_step, offset=half)
    else:
        # Fold 1/2**B into W: weights 2**-(i+1) are exact powers of two in bf16.
        w = _bit_weight_matrix(TN, B, jnp.bfloat16, scale=inv_step)
        kernel = functools.partial(_dequant_kernel, int8_mxu=False,
                                   scale=1.0, offset=half)

    grid = (pl.cdiv(batch, TB), n_pad // TN)

    out = pl.pallas_call(
        kernel,
        out_shape=jax.ShapeDtypeStruct((batch, n_pad), jnp.float32),
        grid=grid,
        in_specs=[
            # x tile: TB rows x (TN*B) bit columns; column block j feeds
            # output column block j (block-diagonal structure of W).
            pl.BlockSpec((TB, TN * B), lambda i, j: (i, j)),
            # W: constant across the grid (same tiny block every step).
            pl.BlockSpec((TN * B, TN), lambda i, j: (0, 0)),
        ],
        out_specs=pl.BlockSpec((TB, TN), lambda i, j: (i, j)),
        compiler_params=pltpu.CompilerParams(
            dimension_semantics=("parallel", "parallel"),
            vmem_limit_bytes=32 * 1024 * 1024),
    )(x, w)

    return out[:, :N] if n_pad != N else out


def dequantization_reference(x, B):
    """Pure-JAX reference mirroring the PyTorch code, for verification."""
    batch, nbits = x.shape
    N = nbits // B
    xr = x.astype(jnp.float32).reshape(batch, N, B)
    weights = 2.0 ** jnp.arange(B - 1, -1, -1, dtype=jnp.float32)
    num = jnp.sum(xr * weights, axis=-1)
    return (num + 0.5) / (2 ** B)


if __name__ == "__main__":
    key = jax.random.PRNGKey(0)
    B = 4

    # Case 1: small shape typical of the module (batch=2), float32 bit-planes,
    # N=32 (not a multiple of 128 -> exercises the pad/crop path), bf16 MXU.
    batch, nbits = 2, 128                      # -> N = 32 outputs per sample
    k1, k2 = jax.random.split(key)
    x_small = jax.random.bernoulli(k1, p=0.5, shape=(batch, nbits)).astype(
        jnp.float32)
    out = jax.block_until_ready(dequantization_layer(x_small, B))
    ref = dequantization_reference(x_small, B)
    assert out.shape == (batch, nbits // B) and out.dtype == jnp.float32
    assert jnp.allclose(out, ref, atol=1e-6, rtol=1e-6)

    # Case 2: tiled grid (N = 256 -> 2 lane-dense N tiles), narrow int8
    # bit-planes.  Auto path uses the int8 MXU on v5e/v6e, bf16 elsewhere.
    batch2, nbits2 = 32, 1024                  # -> N = 256, TN = 128
    x_big = jax.random.bernoulli(k2, p=0.5, shape=(batch2, nbits2)).astype(
        jnp.int8)
    ref2 = dequantization_reference(x_big, B)

    out2 = jax.block_until_ready(dequantization_layer(x_big, B))
    assert out2.shape == (batch2, nbits2 // B) and out2.dtype == jnp.float32
    assert jnp.allclose(out2, ref2, atol=1e-6, rtol=1e-6)

    # Cross-check the bf16 fallback path on the same int8 input.
    out2_bf16 = jax.block_until_ready(
        dequantization_layer(x_big, B, use_int8_mxu=False))
    assert jnp.allclose(out2_bf16, ref2, atol=1e-6, rtol=1e-6)

    print("KERNEL_OK")
</pallas_src>

<mosaic_0001>
module attributes {stable_mosaic.version = 11 : i64} {
  func.func @_dequant_kernel(%arg0: i32, %arg1: i32, %arg2: memref<2x512xf32, #tpu.memory_space<vmem>>, %arg3: memref<512x128xbf16, #tpu.memory_space<vmem>>, %arg4: memref<2x128xf32, #tpu.memory_space<vmem>>) attributes {dimension_semantics = [#tpu.dimension_semantics<parallel>, #tpu.dimension_semantics<parallel>], iteration_bounds = array<i64: 1, 1>, scalar_prefetch = 0 : i64, scratch_operands = 0 : i64, tpu.core_type = #tpu.core_type<tc>, window_params = [{transform_indices = @transform_0, window_bounds = array<i64: 2, 512>}, {pipeline_mode = #tpu.pipeline_mode<synchronous>, transform_indices = @transform_1, window_bounds = array<i64: 512, 128>}, {transform_indices = @transform_2, window_bounds = array<i64: 2, 128>}]} {
    %c0 = arith.constant 0 : index
    %c0_0 = arith.constant 0 : index
    %0 = vector.load %arg2[%c0, %c0_0] : memref<2x512xf32, #tpu.memory_space<vmem>>, vector<2x512xf32>
    %1 = arith.truncf %0 : vector<2x512xf32> to vector<2x512xbf16>
    %c0_1 = arith.constant 0 : index
    %c0_2 = arith.constant 0 : index
    %2 = vector.load %arg3[%c0_1, %c0_2] : memref<512x128xbf16, #tpu.memory_space<vmem>>, vector<512x128xbf16>
    %cst = arith.constant dense<0.000000e+00> : vector<2x128xf32>
    %3 = tpu.matmul %1, %2, %cst {dimension_numbers = #tpu.dot_dimension_numbers<[1], [0], [0], [1], [0, 0, 1, 1], [], []>} : vector<2x512xbf16>, vector<512x128xbf16>, vector<2x128xf32> -> vector<2x128xf32>
    %cst_3 = arith.constant 3.125000e-02 : f32
    %4 = vector.broadcast %cst_3 : f32 to vector<2x128xf32>
    %5 = arith.addf %3, %4 : vector<2x128xf32>
    %c0_4 = arith.constant 0 : index
    %c0_5 = arith.constant 0 : index
    %6 = vector.load %arg4[%c0_4, %c0_5] : memref<2x128xf32, #tpu.memory_space<vmem>>, vector<2x128xf32>
    tpu.vector_store %arg4[%c0_4, %c0_5], %5 {strides = array<i32>} : memref<2x128xf32, #tpu.memory_space<vmem>>, vector<2x128xf32>,
    return
  }
  func.func @transform_0(%arg0: i32, %arg1: i32) -> (i32, i32) {
    %c0_i32 = arith.constant 0 : i32
    return %arg0, %arg1 : i32, i32
  }
  func.func @transform_1(%arg0: i32, %arg1: i32) -> (i32, i32) {
    %c0_i32 = arith.constant 0 : i32
    %c0_i32_0 = arith.constant 0 : i32
    %c0_i32_1 = arith.constant 0 : i32
    return %c0_i32, %c0_i32_0 : i32, i32
  }
  func.func @transform_2(%arg0: i32, %arg1: i32) -> (i32, i32) {
    %c0_i32 = arith.constant 0 : i32
    return %arg0, %arg1 : i32, i32
  }
}

</mosaic_0001>

<bundles_post_ra>
// kernel: tpu_custom_call.1
= control target key start
LH: loop header
LB: loop body
LE: loop exit
PB: predicated region body
PF: predicated region fallthrough
CT: control target
= control target key end

     0   :  { %7 = vsyncpa [#allocation3], 0  ;;  %s670_s0 = inlined_call_operand.hbm [shape: f32[2,512], index: 0, kind: input, shape index: {}]   ;;  %s671_s1 = inlined_call_operand.hbm [shape: bf16[512,128], index: 1, kind: input, shape index: {}]   ;;  %s672_s2 = inlined_call_operand.hbm [shape: f32[2,128], index: 2, kind: output, shape index: {}]  }
   0x1   :  { %8 = vsyncpa [#allocation6], 0 }
   0x2   :  { %9 = vsyncpa [#allocation4], 0  ;;  %s606_s9 = smov [#allocation2]   ;;  %s607_s11 = smov [#allocation5]  }
   0x3   :  { %s16_s10 = sshll.u32 %s606_s9, 4  ;;  %s25_s12 = sshll.u32 %s607_s11, 4  ;;  %s17_s10 = int_to_ptr.vmem [resolvable:$true] %s16_s10  ;;  %s627_s12 = int_to_ptr.vmem [resolvable:$true] %s25_s12 }
   0x4   :  { %s534_s15 = scalar_lea.hbm %s670_s0, 128 }
   0x5   :  { %p535_p0 = scmp.ne.s32.totalorder %s670_s0, %s534_s15  ;;  %p538_p1 = scmp.lt.u32.totalorder %s534_s15, %s670_s0 }
   0x7   :  { %p540_p2 = pnand %p538_p1, %p535_p0 }
   0x9   :  { %543 = shalt.err (!%p540_p2)
}
   0xa   :  { %s544_s20 = scalar_lea.vmem %s17_s10, 128  ;;  %p549_p4 = scmp.lt.s32.totalorder %s17_s10, %s17_s10 }
   0xb   :  { %p545_p3 = scmp.ne.s32.totalorder %s17_s10, %s544_s20  ;;  %p550_p5 = scmp.lt.s32.totalorder %s544_s20, %s544_s20 }
   0xd   :  { %p551_p6 = por %p550_p5, %p549_p4 }
   0xf   :  { %p552_p7 = pnand %p551_p6, %p545_p3 }
  0x11   :  { %555 = shalt.err (!%p552_p7)
}
  0x12   :  { %19 = dma.hbm_to_vmem [thread:$0]  %s670_s0, 128, %s17_s10, [#allocation3]  }
  0x13   :  { %s556_s25 = scalar_lea.hbm %s671_s1, 4096 }
  0x14   :  { %p557_p8 = scmp.ne.s32.totalorder %s671_s1, %s556_s25  ;;  %p560_p9 = scmp.lt.u32.totalorder %s556_s25, %s671_s1 }
  0x16   :  { %p562_p10 = pnand %p560_p9, %p557_p8 }
  0x18   :  { %565 = shalt.err (!%p562_p10)
}
  0x19   :  { %s566_s30 = scalar_lea.vmem %s627_s12, 4096  ;;  %p571_p12 = scmp.lt.s32.totalorder %s627_s12, %s627_s12 }
  0x1a   :  { %p567_p11 = scmp.ne.s32.totalorder %s627_s12, %s566_s30  ;;  %p572_p13 = scmp.lt.s32.totalorder %s566_s30, %s566_s30 }
  0x1c   :  { %p573_p0 = por %p572_p13, %p571_p12 }
  0x1e   :  { %p574_p1 = pnand %p573_p0, %p567_p11 }
  0x20   :  { %577 = shalt.err (!%p574_p1)
}
  0x21   :  { %s608_s0 = smov 64   ;;  %s609_s3 = smov 4  }
  0x22   :  { %31 = dma.hbm_to_vmem [thread:$0]  %s671_s1, 4096, %s627_s12, [#allocation6], %s608_s0, %s608_s0, %s609_s3  }
  0x23   :  { %600 = dma.done.wait [#allocation3], 128  }
  0x24   :  { %601 = vsyncadd [#allocation3], 4294967168 }
  0x25   :  { %602 = dma.done.wait [#allocation6], 4096  }
  0x26   :  { %603 = vsyncadd [#allocation6], 4294963200  ;;  %v501_v0 = vld [vmem:[#allocation5 + $0x40] sm:$0xff]   ;;  %v505_v4 = vld [vmem:[#allocation5 + $0x48] sm:$0xff]   ;;  %v610_v22 = vmov 1983009808   ;;  %v45_v24 = vlaneseq }
  0x27   :  { %v502_v1 = vld [vmem:[#allocation5 + $0xc0] sm:$0xff]   ;;  %451 = vmatprep.subr.bf16.mxu0 %v501_v0  ;;  %v506_v5 = vld [vmem:[#allocation5 + $0xc8] sm:$0xff]   ;;  %v509_v8 = vld [vmem:[#allocation5 + $0x50] sm:$0xff]   ;;  %v43_v23 = vunpack.c.l.s4 %v610_v22  ;;  %s611_s1 = smov [#allocation7]  }
  0x28   :  { %v503_v2 = vld [vmem:[#allocation5] sm:$0xff]   ;;  %473 = vmatprep.subr.bf16.mxu1 %v502_v1  ;;  %v507_v6 = vld [vmem:[#allocation5 + $0x8] sm:$0xff]   ;;  %v510_v9 = vld [vmem:[#allocation5 + $0xd0] sm:$0xff]   ;;  %v46_v30 = vshrl.u32 %v45_v24, 7  ;;  %s409_s6 = sshll.u32 %s611_s1, 4  ;;  %s410_s6 = int_to_ptr.vmem [resolvable:$true] %s409_s6 }
  0x29   :  { %v504_v3 = vld [vmem:[#allocation5 + $0x80] sm:$0xff]   ;;  %452 = vmatpush3.bf16.msra.mxu0 %v503_v2  ;;  %v508_v7 = vld [vmem:[#allocation5 + $0x88] sm:$0xff]   ;;  %v511_v10 = vld [vmem:[#allocation5 + $0x10] sm:$0xff]   ;;  %v44_v29 = vunpack.c.0.s8 %v43_v23  ;;  %s578_s7 = scalar_lea.vmem %s410_s6, 32  ;;  %p583_p3 = scmp.lt.s32.totalorder %s410_s6, %s410_s6 }
  0x2a   :  { %474 = vmatpush3.bf16.msra.mxu1 %v504_v3  ;;  %453 = vmatprep.subr.bf16.mxu0 %v505_v4  ;;  %v512_v11 = vld [vmem:[#allocation5 + $0x90] sm:$0xff]   ;;  %v513_v12 = vld [vmem:[#allocation5 + $0x58] sm:$0xff]   ;;  %v517_v16 = vld [vmem:[#allocation5 + $0x60] sm:$0xff]   ;;  %p579_p2 = scmp.ne.s32.totalorder %s410_s6, %s578_s7  ;;  %p584_p4 = scmp.lt.s32.totalorder %s578_s7, %s578_s7 }
  0x2b   :  { %475 = vmatprep.subr.bf16.mxu1 %v506_v5  ;;  %v514_v13 = vld [vmem:[#allocation5 + $0xd8] sm:$0xff]   ;;  %v518_v17 = vld [vmem:[#allocation5 + $0xe0] sm:$0xff]   ;;  %v521_v20 = vld [vmem:[#allocation5 + $0x68] sm:$0xff]   ;;  %v47_v35 = vsub.s32 %v44_v29, %v46_v30 }
  0x2c   :  { %v515_v14 = vld [vmem:[#allocation5 + $0x18] sm:$0xff]   ;;  %v519_v18 = vld [vmem:[#allocation5 + $0x20] sm:$0xff]   ;;  %v522_v21 = vld [vmem:[#allocation5 + $0xe8] sm:$0xff]   ;;  %p585_p5 = por %p584_p4, %p583_p3 }
  0x2d   :  { %454 = vmatpush3.bf16.msra.mxu0 %v507_v6  ;;  %v516_v15 = vld [vmem:[#allocation5 + $0x98] sm:$0xff]   ;;  %v520_v19 = vld [vmem:[#allocation5 + $0xa0] sm:$0xff]   ;;  %v523_v25 = vld [vmem:[#allocation5 + $0x28] sm:$0xff]  }
  0x2e   :  { %476 = vmatpush3.bf16.msra.mxu1 %v508_v7  ;;  %455 = vmatprep.subr.bf16.mxu0 %v509_v8  ;;  %v524_v26 = vld [vmem:[#allocation5 + $0xa8] sm:$0xff]   ;;  %v525_v27 = vld [vmem:[#allocation5 + $0x70] sm:$0xff]   ;;  %v529_v33 = vld [vmem:[#allocation5 + $0x78] sm:$0xff]   ;;  %p586_p6 = pnand %p585_p5, %p579_p2 }
  0x2f   :  { %477 = vmatprep.subr.bf16.mxu1 %v510_v9  ;;  %v526_v28 = vld [vmem:[#allocation5 + $0xf0] sm:$0xff]   ;;  %v530_v34 = vld [vmem:[#allocation5 + $0xf8] sm:$0xff]  }
  0x30   :  { %v527_v31 = vld [vmem:[#allocation5 + $0x30] sm:$0xff]   ;;  %v531_v36 = vld [vmem:[#allocation5 + $0x38] sm:$0xff]  }
  0x31   :  { %456 = vmatpush3.bf16.msra.mxu0 %v511_v10  ;;  %v528_v32 = vld [vmem:[#allocation5 + $0xb0] sm:$0xff]   ;;  %v532_v37 = vld [vmem:[#allocation5 + $0xb8] sm:$0xff]  }
  0x32   :  { %478 = vmatpush3.bf16.msra.mxu1 %v512_v11  ;;  %457 = vmatprep.subr.bf16.mxu0 %v513_v12  ;;  %v39_v38 = vld [vmem:[#allocation2] sm:$0xff] }
  0x33   :  { %479 = vmatprep.subr.bf16.mxu1 %v514_v13  ;;  %v48_v39 = vrot.slane %v39_v38, %v47_v35  ;;  %v41_v40 = vcombine.high %v39_v38, %v39_v38 }
  0x35   :  { %458 = vmatpush3.bf16.msra.mxu0 %v515_v14  ;;  %v56_v41 = vcombine.high %v48_v39, %v48_v39  ;;  %v55_v42 = vrot.slane %v41_v40, %v47_v35  ;;  %v62_v43 = vpack.c.bf16 %v48_v39, %v48_v39 }
  0x36   :  { %480 = vmatpush3.bf16.msra.mxu1 %v516_v15  ;;  %459 = vmatprep.subr.bf16.mxu0 %v517_v16 }
  0x37   :  { %481 = vmatprep.subr.bf16.mxu1 %v518_v17  ;;  %v63_v44 = vpack.c.bf16 %v56_v41, %v56_v41  ;;  %v57_v45 = vcombine.high %v55_v42, %v55_v42  ;;  %v64_v46 = vpack.c.bf16 %v55_v42, %v55_v42 }
  0x39   :  { %460 = vmatpush3.bf16.msra.mxu0 %v519_v18  ;;  %354 = vmatprep.mubr.bf16.mxu0 %v63_v44  ;;  %v65_v47 = vpack.c.bf16 %v57_v45, %v57_v45 }
  0x3a   :  { %482 = vmatpush3.bf16.msra.mxu1 %v520_v19  ;;  %461 = vmatprep.subr.bf16.mxu0 %v521_v20 }
  0x3b   :  { %483 = vmatprep.subr.bf16.mxu1 %v522_v21  ;;  %394 = vmatprep.mubr.bf16.mxu1 %v65_v47 }
  0x3d   :  { %462 = vmatpush3.bf16.msra.mxu0 %v523_v25 }
  0x3e   :  { %484 = vmatpush3.bf16.msra.mxu1 %v524_v26  ;;  %463 = vmatprep.subr.bf16.mxu0 %v525_v27 }
  0x3f   :  { %485 = vmatprep.subr.bf16.mxu1 %v526_v28 }
  0x41   :  { %464 = vmatpush3.bf16.msra.mxu0 %v527_v31 }
  0x42   :  { %486 = vmatpush3.bf16.msra.mxu1 %v528_v32  ;;  %465 = vmatprep.subr.bf16.mxu0 %v529_v33 }
  0x43   :  { %487 = vmatprep.subr.bf16.mxu1 %v530_v34 }
  0x45   :  { %466 = vmatpush3.bf16.msra.mxu0 %v531_v36 }
  0x46   :  { %488 = vmatpush3.bf16.msra.mxu1 %v532_v37 }
  0x48   :  { %355 = vmatmul.mubr.bf16.vlgmr.msra.gmra.mrb[0].mxu0 %v62_v43 }
  0x49   :  { %395 = vmatmul.mubr.bf16.vlgmr.msra.gmra.mrb[0].mxu1 %v64_v46 }
 0x11b   :  { %v467_v48 = vpop.f32.mrb[0].mxu0 }
 0x11c   :  { %v468_v49 = vpop.f32.mrb[1].mxu0  ;;  %v489_v50 = vpop.f32.mrb[0].mxu1 }
 0x11d   :  { %v469_v51 = vadd.f32 %v468_v49, %v467_v48  ;;  %v470_v52 = vpop.f32.mrb[2].mxu0  ;;  %v490_v53 = vpop.f32.mrb[1].mxu1 }
 0x11e   :  { %v471_v54 = vpop.f32.mrb[3].mxu0  ;;  %v491_v56 = vadd.f32 %v490_v53, %v489_v50  ;;  %v492_v57 = vpop.f32.mrb[2].mxu1 }
 0x11f   :  { %v357_v55 = vadd.f32 0.03125, %v469_v51  ;;  %v493_v58 = vpop.f32.mrb[3].mxu1 }
 0x121   :  { %v397_v59 = vadd.f32 %v491_v56, %v357_v55 }
 0x123   :  { %402 = vst [vmem:[#allocation7] sm:$0x3] %v397_v59 }
 0x124   :  { %589 = shalt.err (!%p586_p6)
}
 0x125   :  { %s590_s10 = scalar_lea.hbm %s672_s2, 32 }
 0x126   :  { %p591_p7 = scmp.ne.s32.totalorder %s672_s2, %s590_s10  ;;  %p594_p8 = scmp.lt.u32.totalorder %s590_s10, %s672_s2 }
 0x128   :  { %p596_p9 = pnand %p594_p8, %p591_p7 }
 0x12a   :  { %599 = shalt.err (!%p596_p9)
}
 0x12b   :  { %412 = dma.vmem_to_hbm [thread:$0]  %s410_s6, 32, %s672_s2, [#allocation4]  }
 0x12c   :  { %604 = dma.done.wait [#allocation4], 32  }
 0x12d   :  { %605 = vsyncadd [#allocation4], 4294967264 }
 0x12e   :  { %416 = vsyncpa [#allocation3], 1 }
 0x12f   :  { %417 = vsyncpa [#allocation6], 1 }
 0x130   :  { %418 = vsyncpa [#allocation4], 1 }

</bundles_post_ra>
